<compile_context>
chip_gen: v6e
topology: v6e:2x2x1
jax: 0.10.0
libtpu: 0.0.40
codegen_flags: <defaults>
</compile_context>

<pallas_src>
import functools

import jax
import jax.numpy as jnp
from jax.experimental import pallas as pl
from jax.experimental.pallas import tpu as pltpu

STATE_DIM = 15
ACTION_DIM = 3
MAX_ACTION = 6.0

H1 = 700
H2 = 500

# Lane-aligned (padded) sizes.
H1_PAD = 768    # 3 * 256
H2_PAD = 512    # 2 * 256
OUT_PAD = 128   # lane-dense output slab; real actions are cols [:3]

TM_MAX = 256    # batch tile (rows per grid step)


def _round_up(x, m):
    return ((x + m - 1) // m) * m


def actor_kernel(x_ref, w1_ref, b1_ref, w2_ref, b2_ref, w3_ref, b3_ref, o_ref):
    # Layer 1: relu(x @ W1 + b1)   (bf16 x bf16 -> f32 accumulate on the MXU)
    x = x_ref[...].astype(jnp.bfloat16)
    h1 = jnp.dot(x, w1_ref[...], preferred_element_type=jnp.float32) + b1_ref[...]
    h1 = jnp.maximum(h1, 0.0)

    # Layer 2: relu(h1 @ W2 + b2)
    h2 = (jnp.dot(h1.astype(jnp.bfloat16), w2_ref[...],
                  preferred_element_type=jnp.float32) + b2_ref[...])
    h2 = jnp.maximum(h2, 0.0)

    # Layer 3: max_action * tanh(h2 @ W3 + b3)   (tanh runs on the EUP)
    h3 = (jnp.dot(h2.astype(jnp.bfloat16), w3_ref[...],
                  preferred_element_type=jnp.float32) + b3_ref[...])
    o_ref[...] = MAX_ACTION * jnp.tanh(h3)


@functools.partial(jax.jit, static_argnames=())
def actor_forward(x, params):
    """x: (B, STATE_DIM) f32 -> actions (B, ACTION_DIM) f32."""
    w1, b1, w2, b2, w3, b3 = params
    B = x.shape[0]

    # Choose a batch tile: up to TM_MAX rows per grid step, sublane-aligned.
    tm = min(TM_MAX, _round_up(B, 8))
    b_pad = _round_up(B, tm)
    if b_pad != B:
        x = jnp.pad(x, ((0, b_pad - B), (0, 0)))
    grid = (b_pad // tm,)

    const_spec = lambda shape: pl.BlockSpec(shape, lambda i: (0, 0))

    out = pl.pallas_call(
        actor_kernel,
        out_shape=jax.ShapeDtypeStruct((b_pad, OUT_PAD), jnp.float32),
        grid=grid,
        in_specs=[
            pl.BlockSpec((tm, STATE_DIM), lambda i: (i, 0)),  # streamed activations
            const_spec(w1.shape), const_spec(b1.shape),        # resident weights
            const_spec(w2.shape), const_spec(b2.shape),
            const_spec(w3.shape), const_spec(b3.shape),
        ],
        out_specs=pl.BlockSpec((tm, OUT_PAD), lambda i: (i, 0)),
        compiler_params=pltpu.CompilerParams(
            dimension_semantics=("parallel",)),
    )(x, w1, b1, w2, b2, w3, b3)

    return out[:B, :ACTION_DIM]


def init_params(key):
    """Synthetic init mirroring PyTorch Linear default
    (uniform(-1/sqrt(fan_in), 1/sqrt(fan_in))), zero-padded to lane-aligned
    shapes.  Weights are stored (in_features, out_features) in bf16; biases f32."""
    ks = jax.random.split(key, 6)

    def lin(kw, kb, fan_in, fan_out):
        bound = 1.0 / jnp.sqrt(fan_in)
        w = jax.random.uniform(kw, (fan_in, fan_out), jnp.float32, -bound, bound)
        b = jax.random.uniform(kb, (1, fan_out), jnp.float32, -bound, bound)
        return w, b

    w1, b1 = lin(ks[0], ks[1], STATE_DIM, H1)
    w2, b2 = lin(ks[2], ks[3], H1, H2)
    w3, b3 = lin(ks[4], ks[5], H2, ACTION_DIM)

    # Zero-pad: extra b1/b2/b3 entries and extra W2/W3 input rows are 0 so the
    # padded channels stay exactly 0 through ReLU and never touch the output.
    w1p = jnp.pad(w1, ((0, 0), (0, H1_PAD - H1)))
    b1p = jnp.pad(b1, ((0, 0), (0, H1_PAD - H1)))
    w2p = jnp.pad(w2, ((0, H1_PAD - H1), (0, H2_PAD - H2)))
    b2p = jnp.pad(b2, ((0, 0), (0, H2_PAD - H2)))
    w3p = jnp.pad(w3, ((0, H2_PAD - H2), (0, OUT_PAD - ACTION_DIM)))
    b3p = jnp.pad(b3, ((0, 0), (0, OUT_PAD - ACTION_DIM)))

    return (w1p.astype(jnp.bfloat16), b1p,
            w2p.astype(jnp.bfloat16), b2p,
            w3p.astype(jnp.bfloat16), b3p)


def actor_reference(x, params):
    """Pure-JAX reference with the same bf16-weight / f32-accumulate math."""
    w1, b1, w2, b2, w3, b3 = params
    h1 = jnp.maximum(
        jnp.dot(x.astype(jnp.bfloat16), w1, preferred_element_type=jnp.float32) + b1, 0.0)
    h2 = jnp.maximum(
        jnp.dot(h1.astype(jnp.bfloat16), w2, preferred_element_type=jnp.float32) + b2, 0.0)
    h3 = jnp.dot(h2.astype(jnp.bfloat16), w3, preferred_element_type=jnp.float32) + b3
    return (MAX_ACTION * jnp.tanh(h3))[:, :ACTION_DIM]


if __name__ == "__main__":
    key = jax.random.PRNGKey(0)
    kx, kp = jax.random.split(key)

    B = 8  # small online-RL batch (multiple of 8 sublanes)
    x = jax.random.normal(kx, (B, STATE_DIM), dtype=jnp.float32)
    params = init_params(kp)

    a = actor_forward(x, params)
    a = jax.block_until_ready(a)

    a_ref = actor_reference(x, params)
    assert a.shape == (B, ACTION_DIM)
    assert bool(jnp.all(jnp.abs(a) <= MAX_ACTION + 1e-3))
    assert jnp.allclose(a, a_ref, atol=5e-3, rtol=5e-3), (
        f"max abs err {float(jnp.max(jnp.abs(a - a_ref)))}")

    print("KERNEL_OK")
</pallas_src>

<mosaic_0001>
module attributes {stable_mosaic.version = 11 : i64} {
  func.func @actor_kernel(%arg0: i32, %arg1: memref<8x15xf32, #tpu.memory_space<vmem>>, %arg2: memref<15x768xbf16, #tpu.memory_space<vmem>>, %arg3: memref<1x768xf32, #tpu.memory_space<vmem>>, %arg4: memref<768x512xbf16, #tpu.memory_space<vmem>>, %arg5: memref<1x512xf32, #tpu.memory_space<vmem>>, %arg6: memref<512x128xbf16, #tpu.memory_space<vmem>>, %arg7: memref<1x128xf32, #tpu.memory_space<vmem>>, %arg8: memref<8x128xf32, #tpu.memory_space<vmem>>) attributes {dimension_semantics = [#tpu.dimension_semantics<parallel>], iteration_bounds = array<i64: 1>, scalar_prefetch = 0 : i64, scratch_operands = 0 : i64, tpu.core_type = #tpu.core_type<tc>, window_params = [{transform_indices = @transform_0, window_bounds = array<i64: 8, 15>}, {pipeline_mode = #tpu.pipeline_mode<synchronous>, transform_indices = @transform_1, window_bounds = array<i64: 15, 768>}, {pipeline_mode = #tpu.pipeline_mode<synchronous>, transform_indices = @transform_2, window_bounds = array<i64: 1, 768>}, {pipeline_mode = #tpu.pipeline_mode<synchronous>, transform_indices = @transform_3, window_bounds = array<i64: 768, 512>}, {pipeline_mode = #tpu.pipeline_mode<synchronous>, transform_indices = @transform_4, window_bounds = array<i64: 1, 512>}, {pipeline_mode = #tpu.pipeline_mode<synchronous>, transform_indices = @transform_5, window_bounds = array<i64: 512, 128>}, {pipeline_mode = #tpu.pipeline_mode<synchronous>, transform_indices = @transform_6, window_bounds = array<i64: 1, 128>}, {transform_indices = @transform_7, window_bounds = array<i64: 8, 128>}]} {
    %c0 = arith.constant 0 : index
    %c0_0 = arith.constant 0 : index
    %0 = vector.load %arg1[%c0, %c0_0] : memref<8x15xf32, #tpu.memory_space<vmem>>, vector<8x15xf32>
    %1 = arith.truncf %0 : vector<8x15xf32> to vector<8x15xbf16>
    %c0_1 = arith.constant 0 : index
    %c0_2 = arith.constant 0 : index
    %2 = vector.load %arg2[%c0_1, %c0_2] : memref<15x768xbf16, #tpu.memory_space<vmem>>, vector<15x768xbf16>
    %cst = arith.constant dense<0.000000e+00> : vector<8x768xf32>
    %3 = tpu.matmul %1, %2, %cst {dimension_numbers = #tpu.dot_dimension_numbers<[1], [0], [0], [1], [0, 0, 1, 1], [], []>} : vector<8x15xbf16>, vector<15x768xbf16>, vector<8x768xf32> -> vector<8x768xf32>
    %c0_3 = arith.constant 0 : index
    %c0_4 = arith.constant 0 : index
    %4 = vector.load %arg3[%c0_3, %c0_4] : memref<1x768xf32, #tpu.memory_space<vmem>>, vector<1x768xf32>
    %5 = vector.broadcast %4 : vector<1x768xf32> to vector<8x768xf32>
    %6 = arith.addf %3, %5 : vector<8x768xf32>
    %cst_5 = arith.constant 0.000000e+00 : f32
    %7 = vector.broadcast %cst_5 : f32 to vector<8x768xf32>
    %8 = arith.maximumf %6, %7 : vector<8x768xf32>
    %9 = arith.truncf %8 : vector<8x768xf32> to vector<8x768xbf16>
    %c0_6 = arith.constant 0 : index
    %c0_7 = arith.constant 0 : index
    %10 = vector.load %arg4[%c0_6, %c0_7] : memref<768x512xbf16, #tpu.memory_space<vmem>>, vector<768x512xbf16>
    %cst_8 = arith.constant dense<0.000000e+00> : vector<8x512xf32>
    %11 = tpu.matmul %9, %10, %cst_8 {dimension_numbers = #tpu.dot_dimension_numbers<[1], [0], [0], [1], [0, 0, 1, 1], [], []>} : vector<8x768xbf16>, vector<768x512xbf16>, vector<8x512xf32> -> vector<8x512xf32>
    %c0_9 = arith.constant 0 : index
    %c0_10 = arith.constant 0 : index
    %12 = vector.load %arg5[%c0_9, %c0_10] : memref<1x512xf32, #tpu.memory_space<vmem>>, vector<1x512xf32>
    %13 = vector.broadcast %12 : vector<1x512xf32> to vector<8x512xf32>
    %14 = arith.addf %11, %13 : vector<8x512xf32>
    %cst_11 = arith.constant 0.000000e+00 : f32
    %15 = vector.broadcast %cst_11 : f32 to vector<8x512xf32>
    %16 = arith.maximumf %14, %15 : vector<8x512xf32>
    %17 = arith.truncf %16 : vector<8x512xf32> to vector<8x512xbf16>
    %c0_12 = arith.constant 0 : index
    %c0_13 = arith.constant 0 : index
    %18 = vector.load %arg6[%c0_12, %c0_13] : memref<512x128xbf16, #tpu.memory_space<vmem>>, vector<512x128xbf16>
    %cst_14 = arith.constant dense<0.000000e+00> : vector<8x128xf32>
    %19 = tpu.matmul %17, %18, %cst_14 {dimension_numbers = #tpu.dot_dimension_numbers<[1], [0], [0], [1], [0, 0, 1, 1], [], []>} : vector<8x512xbf16>, vector<512x128xbf16>, vector<8x128xf32> -> vector<8x128xf32>
    %c0_15 = arith.constant 0 : index
    %c0_16 = arith.constant 0 : index
    %20 = vector.load %arg7[%c0_15, %c0_16] : memref<1x128xf32, #tpu.memory_space<vmem>>, vector<1x128xf32>
    %21 = vector.broadcast %20 : vector<1x128xf32> to vector<8x128xf32>
    %22 = arith.addf %19, %21 : vector<8x128xf32>
    %23 = math.tanh %22 : vector<8x128xf32>
    %cst_17 = arith.constant 6.000000e+00 : f32
    %24 = vector.broadcast %cst_17 : f32 to vector<8x128xf32>
    %25 = arith.mulf %24, %23 : vector<8x128xf32>
    %c0_18 = arith.constant 0 : index
    %c0_19 = arith.constant 0 : index
    %26 = vector.load %arg8[%c0_18, %c0_19] : memref<8x128xf32, #tpu.memory_space<vmem>>, vector<8x128xf32>
    tpu.vector_store %arg8[%c0_18, %c0_19], %25 {strides = array<i32>} : memref<8x128xf32, #tpu.memory_space<vmem>>, vector<8x128xf32>,
    return
  }
  func.func @transform_0(%arg0: i32) -> (i32, i32) {
    %c0_i32 = arith.constant 0 : i32
    %c0_i32_0 = arith.constant 0 : i32
    return %arg0, %c0_i32 : i32, i32
  }
  func.func @transform_1(%arg0: i32) -> (i32, i32) {
    %c0_i32 = arith.constant 0 : i32
    %c0_i32_0 = arith.constant 0 : i32
    %c0_i32_1 = arith.constant 0 : i32
    return %c0_i32, %c0_i32_0 : i32, i32
  }
  func.func @transform_2(%arg0: i32) -> (i32, i32) {
    %c0_i32 = arith.constant 0 : i32
    %c0_i32_0 = arith.constant 0 : i32
    %c0_i32_1 = arith.constant 0 : i32
    return %c0_i32, %c0_i32_0 : i32, i32
  }
  func.func @transform_3(%arg0: i32) -> (i32, i32) {
    %c0_i32 = arith.constant 0 : i32
    %c0_i32_0 = arith.constant 0 : i32
    %c0_i32_1 = arith.constant 0 : i32
    return %c0_i32, %c0_i32_0 : i32, i32
  }
  func.func @transform_4(%arg0: i32) -> (i32, i32) {
    %c0_i32 = arith.constant 0 : i32
    %c0_i32_0 = arith.constant 0 : i32
    %c0_i32_1 = arith.constant 0 : i32
    return %c0_i32, %c0_i32_0 : i32, i32
  }
  func.func @transform_5(%arg0: i32) -> (i32, i32) {
    %c0_i32 = arith.constant 0 : i32
    %c0_i32_0 = arith.constant 0 : i32
    %c0_i32_1 = arith.constant 0 : i32
    return %c0_i32, %c0_i32_0 : i32, i32
  }
  func.func @transform_6(%arg0: i32) -> (i32, i32) {
    %c0_i32 = arith.constant 0 : i32
    %c0_i32_0 = arith.constant 0 : i32
    %c0_i32_1 = arith.constant 0 : i32
    return %c0_i32, %c0_i32_0 : i32, i32
  }
  func.func @transform_7(%arg0: i32) -> (i32, i32) {
    %c0_i32 = arith.constant 0 : i32
    %c0_i32_0 = arith.constant 0 : i32
    return %arg0, %c0_i32 : i32, i32
  }
}

</mosaic_0001>

<bundles_post_ra>
// kernel: actor_forward.1
= control target key start
LH: loop header
LB: loop body
LE: loop exit
PB: predicated region body
PF: predicated region fallthrough
CT: control target
= control target key end

     0   :  { %12 = vsyncpa [#allocation3], 0  ;;  %s2960_s0 = inlined_call_operand.hbm [shape: f32[8,15], index: 0, kind: input, shape index: {}]   ;;  %s2961_s1 = inlined_call_operand.hbm [shape: bf16[15,768], index: 1, kind: input, shape index: {}]   ;;  %s2962_s2 = inlined_call_operand.hbm [shape: f32[1,768], index: 2, kind: input, shape index: {}]   ;;  %s2963_s3 = inlined_call_operand.hbm [shape: bf16[768,512], index: 3, kind: input, shape index: {}]   ;;  %s2964_s4 = inlined_call_operand.vmem [shape: f32[1,512], index: 4, kind: input, shape index: {}]   ;;  %s2965_s5 = inlined_call_operand.hbm [shape: bf16[512,128], index: 5, kind: input, shape index: {}]   ;;  %s2966_s6 = inlined_call_operand.vmem [shape: f32[1,128], index: 6, kind: input, shape index: {}]   ;;  %s2967_s7 = inlined_call_operand.vmem [shape: f32[8,128], index: 7, kind: output, shape index: {}]  }
   0x1   :  { %13 = vsyncpa [#allocation5], 0 }
   0x2   :  { %14 = vsyncpa [#allocation8], 0  ;;  %s2825_s24 = smov [#allocation4]  }
   0x3   :  { %s30_s25 = sshll.u32 %s2825_s24, 4  ;;  %s31_s25 = int_to_ptr.vmem [resolvable:$true] %s30_s25 }
   0x4   :  { %s2727_s26 = scalar_lea.vmem %s31_s25, 768  ;;  %p2732_p1 = scmp.lt.s32.totalorder %s31_s25, %s31_s25 }
   0x5   :  { %p2728_p0 = scmp.ne.s32.totalorder %s31_s25, %s2727_s26  ;;  %p2733_p2 = scmp.lt.s32.totalorder %s2727_s26, %s2727_s26 }
   0x7   :  { %p2734_p3 = por %p2733_p2, %p2732_p1 }
   0x9   :  { %p2735_p4 = pnand %p2734_p3, %p2728_p0 }
   0xb   :  { %2738 = shalt.err (!%p2735_p4)
}
   0xc   :  { %s2826_s27 = smov 384   ;;  %s2827_s28 = smov 24  }
   0xd   :  { %36 = dma.hbm_to_vmem [thread:$0]  %s2961_s1, 768, %s31_s25, [#allocation5], %s2826_s27, %s2826_s27, %s2827_s28  }
   0xe   :  { %s2828_s8 = smov [#allocation7]  }
   0xf   :  { %s52_s9 = sshll.u32 %s2828_s8, 4  ;;  %s53_s9 = int_to_ptr.vmem [resolvable:$true] %s52_s9 }
  0x10   :  { %s2747_s10 = scalar_lea.vmem %s53_s9, 24576  ;;  %p2752_p6 = scmp.lt.s32.totalorder %s53_s9, %s53_s9 }
  0x11   :  { %p2748_p5 = scmp.ne.s32.totalorder %s53_s9, %s2747_s10  ;;  %p2753_p7 = scmp.lt.s32.totalorder %s2747_s10, %s2747_s10 }
  0x13   :  { %p2754_p8 = por %p2753_p7, %p2752_p6 }
  0x15   :  { %p2755_p9 = pnand %p2754_p8, %p2748_p5 }
  0x17   :  { %2758 = shalt.err (!%p2755_p9)
}
  0x18   :  { %s2829_s11 = smov 256   ;;  %s2830_s12 = smov 16  }
  0x19   :  { %58 = dma.hbm_to_vmem [thread:$0]  %s2963_s3, 24576, %s53_s9, [#allocation8], %s2829_s11, %s2829_s11, %s2830_s12  }
  0x1a   :  { %s2831_s15 = smov [#allocation2]   ;;  %s2832_s17 = smov [#allocation6]  }
  0x1b   :  { %s21_s16 = sshll.u32 %s2831_s15, 4  ;;  %s43_s1 = sshll.u32 %s2832_s17, 4  ;;  %s22_s16 = int_to_ptr.vmem [resolvable:$true] %s21_s16  ;;  %s44_s1 = int_to_ptr.vmem [resolvable:$true] %s43_s1 }
  0x1c   :  { %s2767_s18 = scalar_lea.vmem %s22_s16, 128  ;;  %p2772_p11 = scmp.lt.s32.totalorder %s22_s16, %s22_s16 }
  0x1d   :  { %p2768_p10 = scmp.ne.s32.totalorder %s22_s16, %s2767_s18  ;;  %p2773_p12 = scmp.lt.s32.totalorder %s2767_s18, %s2767_s18 }
  0x1f   :  { %p2774_p13 = por %p2773_p12, %p2772_p11 }
  0x21   :  { %p2775_p0 = pnand %p2774_p13, %p2768_p10 }
  0x23   :  { %2778 = shalt.err (!%p2775_p0)
}
  0x24   :  { %24 = dma.hbm_to_vmem [thread:$0]  %s2960_s0, 128, %s22_s16, [#allocation3]  }
  0x25   :  { %s2787_s21 = scalar_lea.vmem %s44_s1, 96  ;;  %p2792_p2 = scmp.lt.s32.totalorder %s44_s1, %s44_s1 }
  0x26   :  { %p2788_p1 = scmp.ne.s32.totalorder %s44_s1, %s2787_s21  ;;  %p2793_p3 = scmp.lt.s32.totalorder %s2787_s21, %s2787_s21 }
  0x28   :  { %p2794_p4 = por %p2793_p3, %p2792_p2 }
  0x2a   :  { %p2795_p5 = pnand %p2794_p4, %p2788_p1 }
  0x2c   :  { %2798 = shalt.err (!%p2795_p5)
}
  0x2d   :  { %46 = dma.hbm_to_vmem [thread:$0]  %s2962_s2, 96, %s44_s1, [#allocation5]  }
  0x2e   :  { %s2833_s23 = smov [#allocation9]  }
  0x2f   :  { %s66_s24 = sshll.u32 %s2833_s23, 4  ;;  %s67_s24 = int_to_ptr.vmem [resolvable:$true] %s66_s24 }
  0x30   :  { %s2807_s25 = scalar_lea.vmem %s67_s24, 4096  ;;  %p2812_p7 = scmp.lt.s32.totalorder %s67_s24, %s67_s24 }
  0x31   :  { %p2808_p6 = scmp.ne.s32.totalorder %s67_s24, %s2807_s25  ;;  %p2813_p8 = scmp.lt.s32.totalorder %s2807_s25, %s2807_s25 }
  0x33   :  { %p2814_p9 = por %p2813_p8, %p2812_p7 }
  0x35   :  { %p2815_p10 = pnand %p2814_p9, %p2808_p6 }
  0x37   :  { %2818 = shalt.err (!%p2815_p10)
}
  0x38   :  { %s2834_s0 = smov 64   ;;  %s2835_s26 = smov 4  }
  0x39   :  { %72 = dma.hbm_to_vmem [thread:$0]  %s2965_s5, 4096, %s67_s24, [#allocation8], %s2834_s0, %s2834_s0, %s2835_s26  }
  0x3a   :  { %2819 = dma.done.wait [#allocation3], 128  }
  0x3b   :  { %2820 = vsyncadd [#allocation3], 4294967168 }
  0x3c   :  { %2821 = dma.done.wait [#allocation5], 864  }
  0x3d   :  { %2822 = vsyncadd [#allocation5], 4294966432 }
  0x3e   :  { %2823 = dma.done.wait [#allocation8], 28672  }
  0x3f   :  { %2824 = vsyncadd [#allocation8], 4294938624  ;;  %vm159_vm0 = vcmask 1046528   ;;  %v2836_v0 = vmov 0   ;;  %vm160_vm1 = vcmask 1047552   ;;  %v2837_v1 = vmov 65535  }
  0x40   :  { %213 = vmatprep.mubr.bf16.mxu0 %v2836_v0  ;;  %254 = vmatprep.mubr.bf16.mxu1 %v2836_v0  ;;  %v161_v2 = vsel %vm159_vm0, 4294967295, %v2837_v1  ;;  %v2388_v4 = vld [vmem:[#allocation4 + $0x4] ss:$24 sps:$4 sm:$0xff]   ;;  %v2392_v7 = vld [vmem:[#allocation4] ss:$24 sps:$4 sm:$0xff]   ;;  %vm155_vm2 = vcmask 121856  }
  0x41   :  { %v162_v3 = vsel %vm160_vm1, %v161_v2, 0  ;;  %v2390_v5 = vld [vmem:[#allocation4 + $0xc] ss:$24 sps:$4 sm:$0xff]   ;;  %v2393_v8 = vld [vmem:[#allocation4 + $0x8] ss:$24 sps:$4 sm:$0xff]   ;;  %v91_v9 = vld [vmem:[#allocation2] sm:$0xff] }
  0x42   :  { %v167_v6 = vand.u32 %v2388_v4, %v162_v3  ;;  %v173_v10 = vand.u32 %v2390_v5, %v162_v3  ;;  %v2394_v11 = vld [vmem:[#allocation4 + $0x10] ss:$24 sps:$4 sm:$0xff]   ;;  %v164_v12 = vand.u32 %v2392_v7, %v162_v3  ;;  %v170_v13 = vand.u32 %v2393_v8, %v162_v3  ;;  %v2396_v14 = vld [vmem:[#allocation4 + $0x14] ss:$24 sps:$4 sm:$0xff]  }
  0x43   :  { %v92_v15 = vpack.c.bf16 %v91_v9, %v91_v9  ;;  %v2399_v16 = vld [vmem:[#allocation7 + $0xe4] ss:$16 sps:$4 sm:$0xff]   ;;  %v179_v17 = vand.u32 %v2396_v14, %v162_v3  ;;  %v176_v18 = vand.u32 %v2394_v11, %v162_v3  ;;  %v2397_v19 = vld [vmem:[#allocation7 + $0xe0] ss:$16 sps:$4 sm:$0xff]  }
  0x44   :  { %195 = vmatprep.subr.bf16.mxu0 %v167_v6  ;;  %236 = vmatprep.subr.bf16.mxu1 %v173_v10  ;;  %v2402_v20 = vld [vmem:[#allocation7 + $0x2e4] ss:$16 sps:$4 sm:$0xff]   ;;  %v2403_v22 = vld [vmem:[#allocation7 + $0xc0] ss:$16 sps:$4 sm:$0xff]  }
  0x45   :  { %196 = vmatpush1.bf16.msra.mxu0 %v164_v12  ;;  %237 = vmatpush1.bf16.msra.mxu1 %v170_v13  ;;  %v2405_v21 = vld [vmem:[#allocation7 + $0xc4] ss:$16 sps:$4 sm:$0xff]   ;;  %v2400_v24 = vld [vmem:[#allocation7 + $0x2e0] ss:$16 sps:$4 sm:$0xff]  }
  0x46   :  { %1490 = vmatprep.subr.bf16.mxu1 %v2399_v16  ;;  %277 = vmatprep.subr.bf16.mxu0 %v179_v17  ;;  %v2411_v23 = vld [vmem:[#allocation7 + $0xa4] ss:$16 sps:$4 sm:$0xff]   ;;  %v2409_v26 = vld [vmem:[#allocation7 + $0xa0] ss:$16 sps:$4 sm:$0xff]  }
  0x47   :  { %v2408_v25 = vld [vmem:[#allocation7 + $0x2c4] ss:$16 sps:$4 sm:$0xff]   ;;  %v2406_v28 = vld [vmem:[#allocation7 + $0x2c0] ss:$16 sps:$4 sm:$0xff]  }
  0x48   :  { %2103 = vmatmul.mubr.msk.bf16.vlgmr.msra.gmra.mxu0 %vm155_vm2, %v92_v15  ;;  %2104 = vmatmul.mubr.msk.bf16.vlgmr.msra.gmra.mxu1 %vm155_vm2, %v92_v15  ;;  %v2417_v27 = vld [vmem:[#allocation7 + $0x84] ss:$16 sps:$4 sm:$0xff]   ;;  %v2415_v30 = vld [vmem:[#allocation7 + $0x80] ss:$16 sps:$4 sm:$0xff]  }
  0x49   :  { %278 = vmatpush1.bf16.msra.mxu0 %v176_v18  ;;  %295 = vmatprep.mubr.bf16.mxu0 %v2836_v0  ;;  %v2414_v29 = vld [vmem:[#allocation7 + $0x2a4] ss:$16 sps:$4 sm:$0xff]   ;;  %v2412_v32 = vld [vmem:[#allocation7 + $0x2a0] ss:$16 sps:$4 sm:$0xff]  }
  0x4a   :  { %1531 = vmatprep.subr.bf16.mxu0 %v2402_v20  ;;  %1491 = vmatpush1.bf16.msra.mxu1 %v2397_v19  ;;  %v2423_v31 = vld [vmem:[#allocation7 + $0x64] ss:$16 sps:$4 sm:$0xff]   ;;  %v2421_v34 = vld [vmem:[#allocation7 + $0x60] ss:$16 sps:$4 sm:$0xff]   ;;  %v2498_v19 = vld [vmem:[#allocation7 + $0xec] ss:$16 sps:$4 sm:$0xff]   ;;  %v101_v20 = vlaneseq }
  0x4b   :  { %1492 = vmatprep.subr.bf16.mxu1 %v2405_v21  ;;  %v2420_v33 = vld [vmem:[#allocation7 + $0x284] ss:$16 sps:$4 sm:$0xff]   ;;  %v2418_v36 = vld [vmem:[#allocation7 + $0x280] ss:$16 sps:$4 sm:$0xff]  }
  0x4c   :  { %v2429_v35 = vld [vmem:[#allocation7 + $0x44] ss:$16 sps:$4 sm:$0xff]   ;;  %v2427_v38 = vld [vmem:[#allocation7 + $0x40] ss:$16 sps:$4 sm:$0xff]   ;;  %v2896_v21 = vshrl.u32 %v101_v20, 7 }
  0x4d   :  { %v2426_v37 = vld [vmem:[#allocation7 + $0x264] ss:$16 sps:$4 sm:$0xff]   ;;  %v2424_v40 = vld [vmem:[#allocation7 + $0x260] ss:$16 sps:$4 sm:$0xff]  }
  0x4e   :  { %1493 = vmatpush1.bf16.msra.mxu1 %v2403_v22  ;;  %v2435_v39 = vld [vmem:[#allocation7 + $0x24] ss:$16 sps:$4 sm:$0xff]   ;;  %v2433_v42 = vld [vmem:[#allocation7 + $0x20] ss:$16 sps:$4 sm:$0xff]   ;;  %v103_v22 = vsub.s32 0, %v2896_v21 }
  0x4f   :  { %1494 = vmatprep.subr.bf16.mxu1 %v2411_v23  ;;  %v2432_v41 = vld [vmem:[#allocation7 + $0x244] ss:$16 sps:$4 sm:$0xff]   ;;  %v2430_v44 = vld [vmem:[#allocation7 + $0x240] ss:$16 sps:$4 sm:$0xff]   ;;  %v111_v23 = vsub.s32 2, %v2896_v21 }
  0x50   :  { %2105 = vmatmul.mubr.msk.bf16.vlgmr.msra.gmra.mxu0 %vm155_vm2, %v92_v15  ;;  %v2441_v43 = vld [vmem:[#allocation7 + $0x4] ss:$16 sps:$4 sm:$0xff]   ;;  %v2439_v46 = vld [vmem:[#allocation7] ss:$16 sps:$4 sm:$0xff]  }
  0x51   :  { %1532 = vmatpush1.bf16.msra.mxu0 %v2400_v24  ;;  %v2438_v45 = vld [vmem:[#allocation7 + $0x224] ss:$16 sps:$4 sm:$0xff]   ;;  %v2436_v48 = vld [vmem:[#allocation7 + $0x220] ss:$16 sps:$4 sm:$0xff]   ;;  %v2900_v24 = vld [vmem:[#allocation6] sm:$0x3f] }
  0x52   :  { %1533 = vmatprep.subr.bf16.mxu0 %v2408_v25  ;;  %1495 = vmatpush1.bf16.msra.mxu1 %v2409_v26  ;;  %v2447_v47 = vld [vmem:[#allocation7 + $0x1e4] ss:$16 sps:$4 sm:$0xff]   ;;  %v2445_v50 = vld [vmem:[#allocation7 + $0x1e0] ss:$16 sps:$4 sm:$0xff]   ;;  %v107_v25 = vsub.s32 1, %v2896_v21  ;;  %v115_v26 = vsub.s32 3, %v2896_v21 }
  0x53   :  { %1496 = vmatprep.subr.bf16.mxu1 %v2417_v27  ;;  %v2444_v49 = vld [vmem:[#allocation7 + $0x204] ss:$16 sps:$4 sm:$0xff]   ;;  %v2442_v52 = vld [vmem:[#allocation7 + $0x200] ss:$16 sps:$4 sm:$0xff]   ;;  %v104_v27 = vrot.slane %v2900_v24, %v103_v22 }
  0x54   :  { %v2453_v51 = vld [vmem:[#allocation7 + $0x1c4] ss:$16 sps:$4 sm:$0xff]   ;;  %v2451_v54 = vld [vmem:[#allocation7 + $0x1c0] ss:$16 sps:$4 sm:$0xff]  }
  0x55   :  { %1534 = vmatpush1.bf16.msra.mxu0 %v2406_v28  ;;  %v2450_v53 = vld [vmem:[#allocation7 + $0x3e4] ss:$16 sps:$4 sm:$0xff]   ;;  %v2448_v56 = vld [vmem:[#allocation7 + $0x3e0] ss:$16 sps:$4 sm:$0xff]   ;;  %v112_v28 = vrot.slane %v2900_v24, %v111_v23 }
  0x56   :  { %1535 = vmatprep.subr.bf16.mxu0 %v2414_v29  ;;  %1497 = vmatpush1.bf16.msra.mxu1 %v2415_v30  ;;  %v2459_v55 = vld [vmem:[#allocation7 + $0x1a4] ss:$16 sps:$4 sm:$0xff]   ;;  %v2457_v58 = vld [vmem:[#allocation7 + $0x1a0] ss:$16 sps:$4 sm:$0xff]   ;;  %v108_v29 = vrot.slane %v2900_v24, %v107_v25  ;;  %v116_v30 = vrot.slane %v2900_v24, %v115_v26 }
  0x57   :  { %1498 = vmatprep.subr.bf16.mxu1 %v2423_v31  ;;  %v2456_v57 = vld [vmem:[#allocation7 + $0x3c4] ss:$16 sps:$4 sm:$0xff]   ;;  %v2454_v60 = vld [vmem:[#allocation7 + $0x3c0] ss:$16 sps:$4 sm:$0xff]  }
  0x58   :  { %v2465_v59 = vld [vmem:[#allocation7 + $0x184] ss:$16 sps:$4 sm:$0xff]   ;;  %v2463_v62 = vld [vmem:[#allocation7 + $0x180] ss:$16 sps:$4 sm:$0xff]  }
  0x59   :  { %1536 = vmatpush1.bf16.msra.mxu0 %v2412_v32  ;;  %v2462_v61 = vld [vmem:[#allocation7 + $0x3a4] ss:$16 sps:$4 sm:$0xff]   ;;  %v2460_v0 = vld [vmem:[#allocation7 + $0x3a0] ss:$16 sps:$4 sm:$0xff]  }
  0x5a   :  { %1537 = vmatprep.subr.bf16.mxu0 %v2420_v33  ;;  %1499 = vmatpush1.bf16.msra.mxu1 %v2421_v34  ;;  %v2471_v63 = vld [vmem:[#allocation7 + $0x164] ss:$16 sps:$4 sm:$0xff]   ;;  %v2469_v2 = vld [vmem:[#allocation7 + $0x160] ss:$16 sps:$4 sm:$0xff]  }
  0x5b   :  { %1500 = vmatprep.subr.bf16.mxu1 %v2429_v35  ;;  %v2468_v1 = vld [vmem:[#allocation7 + $0x384] ss:$16 sps:$4 sm:$0xff]   ;;  %v2466_v4 = vld [vmem:[#allocation7 + $0x380] ss:$16 sps:$4 sm:$0xff]  }
  0x5c   :  { %v2477_v3 = vld [vmem:[#allocation7 + $0x144] ss:$16 sps:$4 sm:$0xff]   ;;  %v2475_v6 = vld [vmem:[#allocation7 + $0x140] ss:$16 sps:$4 sm:$0xff]  }
  0x5d   :  { %1538 = vmatpush1.bf16.msra.mxu0 %v2418_v36  ;;  %v2474_v5 = vld [vmem:[#allocation7 + $0x364] ss:$16 sps:$4 sm:$0xff]   ;;  %v2472_v7 = vld [vmem:[#allocation7 + $0x360] ss:$16 sps:$4 sm:$0xff]  }
  0x5e   :  { %1539 = vmatprep.subr.bf16.mxu0 %v2426_v37  ;;  %1501 = vmatpush1.bf16.msra.mxu1 %v2427_v38  ;;  %v2480_v8 = vld [vmem:[#allocation7 + $0x344] ss:$16 sps:$4 sm:$0xff]   ;;  %v2478_v9 = vld [vmem:[#allocation7 + $0x340] ss:$16 sps:$4 sm:$0xff]  }
  0x5f   :  { %1502 = vmatprep.subr.bf16.mxu1 %v2435_v39  ;;  %v2483_v10 = vld [vmem:[#allocation7 + $0x124] ss:$16 sps:$4 sm:$0xff]   ;;  %v2481_v12 = vld [vmem:[#allocation7 + $0x120] ss:$16 sps:$4 sm:$0xff]  }
  0x60   :  { %v2486_v11 = vld [vmem:[#allocation7 + $0x324] ss:$16 sps:$4 sm:$0xff]   ;;  %v2484_v13 = vld [vmem:[#allocation7 + $0x320] ss:$16 sps:$4 sm:$0xff]  }
  0x61   :  { %1540 = vmatpush1.bf16.msra.mxu0 %v2424_v40  ;;  %v2489_v14 = vld [vmem:[#allocation7 + $0x104] ss:$16 sps:$4 sm:$0xff]   ;;  %v2487_v16 = vld [vmem:[#allocation7 + $0x100] ss:$16 sps:$4 sm:$0xff]   ;;  %v123_v40 = vsub.s32 5, %v2896_v21 }
  0x62   :  { %1541 = vmatprep.subr.bf16.mxu0 %v2432_v41  ;;  %1503 = vmatpush1.bf16.msra.mxu1 %v2433_v42  ;;  %v2492_v15 = vld [vmem:[#allocation7 + $0x304] ss:$16 sps:$4 sm:$0xff]   ;;  %v2490_v17 = vld [vmem:[#allocation7 + $0x300] ss:$16 sps:$4 sm:$0xff]  }
  0x63   :  { %1504 = vmatprep.subr.bf16.mxu1 %v2441_v43  ;;  %v2495_v18 = vld [vmem:[#allocation7 + $0x4e4] ss:$16 sps:$4 sm:$0xff]   ;;  %v2529_v20 = vld [vmem:[#allocation7 + $0x420] ss:$16 sps:$4 sm:$0xff]  }
  0x65   :  { %1542 = vmatpush1.bf16.msra.mxu0 %v2430_v44 }
  0x66   :  { %1543 = vmatprep.subr.bf16.mxu0 %v2438_v45  ;;  %1505 = vmatpush1.bf16.msra.mxu1 %v2439_v46 }
  0x67   :  { %1506 = vmatprep.subr.bf16.mxu1 %v2447_v47 }
  0x69   :  { %1544 = vmatpush1.bf16.msra.mxu0 %v2436_v48 }
  0x6a   :  { %1545 = vmatprep.subr.bf16.mxu0 %v2444_v49  ;;  %1507 = vmatpush2.bf16.msra.mxu1 %v2445_v50 }
  0x6b   :  { %1508 = vmatprep.subr.bf16.mxu1 %v2453_v51  ;;  %v2493_v51 = vld [vmem:[#allocation7 + $0x4e0] ss:$16 sps:$4 sm:$0xff]  }
  0x6d   :  { %1546 = vmatpush1.bf16.msra.mxu0 %v2442_v52  ;;  %v2496_v52 = vld [vmem:[#allocation7 + $0xe8] ss:$16 sps:$4 sm:$0xff]  }
  0x6e   :  { %1547 = vmatprep.subr.bf16.mxu0 %v2450_v53  ;;  %1509 = vmatpush2.bf16.msra.mxu1 %v2451_v54  ;;  %v124_v53 = vrot.slane %v2900_v24, %v123_v40  ;;  %v2555_v40 = vld [vmem:[#allocation7 + $0x5a4] ss:$16 sps:$4 sm:$0xff]  }
  0x6f   :  { %1510 = vmatprep.subr.bf16.mxu1 %v2459_v55  ;;  %v2501_v55 = vld [vmem:[#allocation7 + $0x4c4] ss:$16 sps:$4 sm:$0xff]  }
  0x71   :  { %1548 = vmatpush2.bf16.msra.mxu0 %v2448_v56 }
  0x72   :  { %1549 = vmatprep.subr.bf16.mxu0 %v2456_v57  ;;  %1511 = vmatpush2.bf16.msra.mxu1 %v2457_v58  ;;  %v2504_v57 = vld [vmem:[#allocation7 + $0xcc] ss:$16 sps:$4 sm:$0xff]  }
  0x73   :  { %1512 = vmatprep.subr.bf16.mxu1 %v2465_v59  ;;  %v2499_v59 = vld [vmem:[#allocation7 + $0x4c0] ss:$16 sps:$4 sm:$0xff]  }
  0x75   :  { %1550 = vmatpush2.bf16.msra.mxu0 %v2454_v60  ;;  %v2502_v60 = vld [vmem:[#allocation7 + $0xc8] ss:$16 sps:$4 sm:$0xff]  }
  0x76   :  { %1551 = vmatprep.subr.bf16.mxu0 %v2462_v61  ;;  %1513 = vmatpush2.bf16.msra.mxu1 %v2463_v62  ;;  %v2507_v62 = vld [vmem:[#allocation7 + $0x4a4] ss:$16 sps:$4 sm:$0xff]  }
  0x77   :  { %1514 = vmatprep.subr.bf16.mxu1 %v2471_v63  ;;  %v2510_v63 = vld [vmem:[#allocation7 + $0xac] ss:$16 sps:$4 sm:$0xff]  }
  0x79   :  { %1552 = vmatpush2.bf16.msra.mxu0 %v2460_v0 }
  0x7a   :  { %1553 = vmatprep.subr.bf16.mxu0 %v2468_v1  ;;  %1515 = vmatpush2.bf16.msra.mxu1 %v2469_v2 }
  0x7b   :  { %1516 = vmatprep.subr.bf16.mxu1 %v2477_v3  ;;  %v2505_v3 = vld [vmem:[#allocation7 + $0x4a0] ss:$16 sps:$4 sm:$0xff]  }
  0x7d   :  { %1554 = vmatpush2.bf16.msra.mxu0 %v2466_v4  ;;  %v2508_v4 = vld [vmem:[#allocation7 + $0xa8] ss:$16 sps:$4 sm:$0xff]  }
  0x7e   :  { %1555 = vmatprep.subr.bf16.mxu0 %v2474_v5  ;;  %1517 = vmatpush2.bf16.msra.mxu1 %v2475_v6  ;;  %v2513_v6 = vld [vmem:[#allocation7 + $0x484] ss:$16 sps:$4 sm:$0xff]  }
  0x7f   :  { %1518 = vmatprep.subr.bf16.mxu1 %v2483_v10  ;;  %v2519_v10 = vld [vmem:[#allocation7 + $0x464] ss:$16 sps:$4 sm:$0xff]  }
  0x81   :  { %1556 = vmatpush2.bf16.msra.mxu0 %v2472_v7  ;;  %v2516_v7 = vld [vmem:[#allocation7 + $0x8c] ss:$16 sps:$4 sm:$0xff]  }
  0x82   :  { %1557 = vmatprep.subr.bf16.mxu0 %v2480_v8  ;;  %1519 = vmatpush2.bf16.msra.mxu1 %v2481_v12  ;;  %v2511_v8 = vld [vmem:[#allocation7 + $0x480] ss:$16 sps:$4 sm:$0xff]  }
  0x83   :  { %1520 = vmatprep.subr.bf16.mxu1 %v2489_v14  ;;  %v2517_v12 = vld [vmem:[#allocation7 + $0x460] ss:$16 sps:$4 sm:$0xff]   ;;  %v2525_v14 = vld [vmem:[#allocation7 + $0x444] ss:$16 sps:$4 sm:$0xff]  }
  0x85   :  { %1558 = vmatpush2.bf16.msra.mxu0 %v2478_v9  ;;  %v2514_v9 = vld [vmem:[#allocation7 + $0x88] ss:$16 sps:$4 sm:$0xff]  }
  0x86   :  { %1559 = vmatprep.subr.bf16.mxu0 %v2486_v11  ;;  %1521 = vmatpush2.bf16.msra.mxu1 %v2487_v16  ;;  %v2522_v11 = vld [vmem:[#allocation7 + $0x6c] ss:$16 sps:$4 sm:$0xff]   ;;  %v2523_v16 = vld [vmem:[#allocation7 + $0x440] ss:$16 sps:$4 sm:$0xff]  }
  0x87   :  { %1572 = vmatprep.subr.bf16.mxu1 %v2495_v18  ;;  %v2531_v18 = vld [vmem:[#allocation7 + $0x424] ss:$16 sps:$4 sm:$0xff]  }
  0x89   :  { %1560 = vmatpush2.bf16.msra.mxu0 %v2484_v13  ;;  %v2520_v13 = vld [vmem:[#allocation7 + $0x68] ss:$16 sps:$4 sm:$0xff]  }
  0x8a   :  { %1561 = vmatprep.subr.bf16.mxu0 %v2492_v15  ;;  %v2528_v15 = vld [vmem:[#allocation7 + $0x4c] ss:$16 sps:$4 sm:$0xff]  }
  0x8d   :  { %1562 = vmatpush2.bf16.msra.mxu0 %v2490_v17  ;;  %v2526_v17 = vld [vmem:[#allocation7 + $0x48] ss:$16 sps:$4 sm:$0xff]  }
  0x8e   :  { %1613 = vmatprep.subr.bf16.mxu0 %v2498_v19  ;;  %v2534_v19 = vld [vmem:[#allocation7 + $0x2c] ss:$16 sps:$4 sm:$0xff]  }
 0x108   :  { %v215_v31 = vpop.f32.mrf.mxu0  ;;  %v256_v32 = vpop.f32.mrf.mxu1 }
 0x109   :  { %v216_v33 = vadd.f32 %v215_v31, %v104_v27  ;;  %v257_v34 = vadd.f32 %v256_v32, %v112_v28  ;;  %v2532_v27 = vld [vmem:[#allocation7 + $0x28] ss:$16 sps:$4 sm:$0xff]   ;;  %v2537_v28 = vld [vmem:[#allocation7 + $0x404] ss:$16 sps:$4 sm:$0xff]  }
 0x10a   :  { %v217_v35 = vpop.f32.mrf.mxu0  ;;  %v258_v36 = vpop.f32.mrf.mxu1  ;;  %v2538_v31 = vld [vmem:[#allocation7 + $0x8] ss:$16 sps:$4 sm:$0xff]   ;;  %v2543_v32 = vld [vmem:[#allocation7 + $0x5e4] ss:$16 sps:$4 sm:$0xff]  }
 0x10b   :  { %v306_v37 = vmax.f32 %v257_v34, 0.0  ;;  %v218_v38 = vadd.f32 %v217_v35, %v108_v29  ;;  %v259_v39 = vadd.f32 %v258_v36, %v116_v30  ;;  %v304_v41 = vmax.f32 %v216_v33, 0.0  ;;  %v2540_v29 = vld [vmem:[#allocation7 + $0xc] ss:$16 sps:$4 sm:$0xff]   ;;  %v2535_v30 = vld [vmem:[#allocation7 + $0x400] ss:$16 sps:$4 sm:$0xff]  }
 0x10c   :  { %v219_v42 = vpop.f32.mrf.mxu0  ;;  %v260_v43 = vpop.f32.mrf.mxu1  ;;  %v2546_v33 = vld [vmem:[#allocation7 + $0x1ec] ss:$16 sps:$4 sm:$0xff]   ;;  %v2541_v34 = vld [vmem:[#allocation7 + $0x5e0] ss:$16 sps:$4 sm:$0xff]   ;;  %v2544_v35 = vld [vmem:[#allocation7 + $0x1e8] ss:$16 sps:$4 sm:$0xff]  }
 0x10d   :  { %v305_v44 = vmax.f32 %v218_v38, 0.0  ;;  %v307_v45 = vmax.f32 %v259_v39, 0.0  ;;  %v2917_v46 = vpack.c.bf16 %v306_v37, %v306_v37  ;;  %v2922_v54 = vpack.c.bf16 %v304_v41, %v304_v41  ;;  %v2549_v36 = vld [vmem:[#allocation7 + $0x5c4] ss:$16 sps:$4 sm:$0xff]   ;;  %v2552_v37 = vld [vmem:[#allocation7 + $0x1cc] ss:$16 sps:$4 sm:$0xff]  }
 0x10e   :  { %v220_v47 = vpop.f32.mrf.mxu0  ;;  %v261_v48 = vpop.f32.mrf.mxu1  ;;  %v2547_v38 = vld [vmem:[#allocation7 + $0x5c0] ss:$16 sps:$4 sm:$0xff]   ;;  %v2550_v39 = vld [vmem:[#allocation7 + $0x1c8] ss:$16 sps:$4 sm:$0xff]   ;;  %v2558_v41 = vld [vmem:[#allocation7 + $0x1ac] ss:$16 sps:$4 sm:$0xff]  }
 0x10f   :  { %v311_v49 = vpack.c.bf16 %v305_v44, %v305_v44  ;;  %v2919_v50 = vpack.c.bf16 %v307_v45, %v307_v45  ;;  %v2553_v42 = vld [vmem:[#allocation7 + $0x5a0] ss:$16 sps:$4 sm:$0xff]   ;;  %v2556_v43 = vld [vmem:[#allocation7 + $0x1a8] ss:$16 sps:$4 sm:$0xff]   ;;  %v2561_v44 = vld [vmem:[#allocation7 + $0x584] ss:$16 sps:$4 sm:$0xff]  }
 0x110   :  { %v2924_v56 = vpop.f32.mrf.mxu0  ;;  %v2564_v45 = vld [vmem:[#allocation7 + $0x18c] ss:$16 sps:$4 sm:$0xff]   ;;  %v2559_v47 = vld [vmem:[#allocation7 + $0x580] ss:$16 sps:$4 sm:$0xff]   ;;  %v2562_v48 = vld [vmem:[#allocation7 + $0x188] ss:$16 sps:$4 sm:$0xff]  }
 0x111   :  { %1522 = vmatprep.mubr.bf16.mxu1 %v311_v49  ;;  %1563 = vmatprep.mubr.bf16.mxu0 %v2919_v50 }
 0x112   :  { %1523 = vmatmul.mubr.bf16.vlgmr.msra.gmra.mxu1 %v2922_v54  ;;  %1564 = vmatmul.mubr.bf16.vlgmr.msra.gmra.mxu0 %v2917_v46  ;;  %v299_v58 = vpop.f32.mrf.mxu0 }
 0x113   :  { %1573 = vmatpush1.bf16.msra.mxu1 %v2493_v51  ;;  %1614 = vmatpush1.bf16.msra.mxu0 %v2496_v52  ;;  %v300_v61 = vadd.f32 %v299_v58, %v124_v53  ;;  %v2570_v51 = vld [vmem:[#allocation7 + $0x16c] ss:$16 sps:$4 sm:$0xff]   ;;  %v2565_v52 = vld [vmem:[#allocation7 + $0x560] ss:$16 sps:$4 sm:$0xff]   ;;  %v2568_v53 = vld [vmem:[#allocation7 + $0x168] ss:$16 sps:$4 sm:$0xff]  }
 0x114   :  { %1645 = vmatprep.mubr.bf16.mxu0 %v311_v49  ;;  %1574 = vmatprep.subr.bf16.mxu1 %v2501_v55  ;;  %v301_v0 = vpop.f32.mrf.mxu0  ;;  %v2567_v49 = vld [vmem:[#allocation7 + $0x564] ss:$16 sps:$4 sm:$0xff]   ;;  %v119_v55 = vsub.s32 4, %v2896_v21  ;;  %v2576_v58 = vld [vmem:[#allocation7 + $0x14c] ss:$16 sps:$4 sm:$0xff]  }
 0x115   :  { %1615 = vmatprep.subr.bf16.mxu0 %v2504_v57  ;;  %v309_v1 = vmax.f32 %v300_v61, 0.0  ;;  %v2573_v57 = vld [vmem:[#allocation7 + $0x544] ss:$16 sps:$4 sm:$0xff]   ;;  %v2577_v0 = vld [vmem:[#allocation7 + $0x520] ss:$16 sps:$4 sm:$0xff]  }
 0x116   :  { %v302_v2 = vpop.f32.mrf.mxu0  ;;  %v120_v61 = vrot.slane %v2900_v24, %v119_v55  ;;  %v2591_v24 = vld [vmem:[#allocation7 + $0x2ec] ss:$16 sps:$4 sm:$0xff]  }
 0x117   :  { %1575 = vmatpush1.bf16.msra.mxu1 %v2499_v59  ;;  %1616 = vmatpush1.bf16.msra.mxu0 %v2502_v60  ;;  %v2929_v5 = vpack.c.bf16 %v309_v1, %v309_v1  ;;  %v2571_v59 = vld [vmem:[#allocation7 + $0x540] ss:$16 sps:$4 sm:$0xff]   ;;  %v2574_v60 = vld [vmem:[#allocation7 + $0x148] ss:$16 sps:$4 sm:$0xff]   ;;  %v2654_v55 = vld [vmem:[#allocation7 + $0x5ac] ss:$16 sps:$4 sm:$0xff]  }
 0x118   :  { %1576 = vmatprep.subr.bf16.mxu1 %v2507_v62  ;;  %1617 = vmatprep.subr.bf16.mxu0 %v2510_v63  ;;  %v2579_v62 = vld [vmem:[#allocation7 + $0x524] ss:$16 sps:$4 sm:$0xff]   ;;  %v2582_v63 = vld [vmem:[#allocation7 + $0x12c] ss:$16 sps:$4 sm:$0xff]   ;;  %v2580_v1 = vld [vmem:[#allocation7 + $0x128] ss:$16 sps:$4 sm:$0xff]   ;;  %v298_v2 = vadd.f32 %v2924_v56, %v120_v61 }
 0x119   :  { %1604 = vmatprep.mubr.bf16.mxu1 %v2929_v5  ;;  %v2592_v56 = vld [vmem:[#allocation7 + $0x4e8] ss:$16 sps:$4 sm:$0xff]  }
 0x11a   :  { %v2655_v61 = vld [vmem:[#allocation7 + $0x388] ss:$16 sps:$4 sm:$0xff]  }
 0x11b   :  { %1577 = vmatpush1.bf16.msra.mxu1 %v2505_v3  ;;  %1618 = vmatpush1.bf16.msra.mxu0 %v2508_v4  ;;  %v2585_v3 = vld [vmem:[#allocation7 + $0x504] ss:$16 sps:$4 sm:$0xff]   ;;  %v2588_v4 = vld [vmem:[#allocation7 + $0x10c] ss:$16 sps:$4 sm:$0xff]  }
 0x11c   :  { %1578 = vmatprep.subr.bf16.mxu1 %v2513_v6  ;;  %1619 = vmatprep.subr.bf16.mxu0 %v2516_v7  ;;  %v2583_v6 = vld [vmem:[#allocation7 + $0x500] ss:$16 sps:$4 sm:$0xff]   ;;  %v2586_v7 = vld [vmem:[#allocation7 + $0x108] ss:$16 sps:$4 sm:$0xff]  }
 0x11f   :  { %1579 = vmatpush1.bf16.msra.mxu1 %v2511_v8  ;;  %1620 = vmatpush1.bf16.msra.mxu0 %v2514_v9  ;;  %v308_v8 = vmax.f32 %v298_v2, 0.0  ;;  %v2594_v9 = vld [vmem:[#allocation7 + $0x4ec] ss:$16 sps:$4 sm:$0xff]   ;;  %v2664_v2 = vld [vmem:[#allocation7 + $0x568] ss:$16 sps:$4 sm:$0xff]  }
 0x120   :  { %1580 = vmatprep.subr.bf16.mxu1 %v2519_v10  ;;  %1621 = vmatprep.subr.bf16.mxu0 %v2522_v11  ;;  %v2589_v10 = vld [vmem:[#allocation7 + $0x2e8] ss:$16 sps:$4 sm:$0xff]  }
 0x121   :  { %v2935_v11 = vpack.c.bf16 %v308_v8, %v308_v8  ;;  %v2675_v8 = vld [vmem:[#allocation7 + $0x32c] ss:$16 sps:$4 sm:$0xff]  }
 0x123   :  { %1581 = vmatpush1.bf16.msra.mxu1 %v2517_v12  ;;  %1622 = vmatpush1.bf16.msra.mxu0 %v2520_v13  ;;  %v2597_v12 = vld [vmem:[#allocation7 + $0x2cc] ss:$16 sps:$4 sm:$0xff]  }
 0x124   :  { %1582 = vmatprep.subr.bf16.mxu1 %v2525_v14  ;;  %1623 = vmatprep.subr.bf16.mxu0 %v2528_v15  ;;  %v2600_v13 = vld [vmem:[#allocation7 + $0x4cc] ss:$16 sps:$4 sm:$0xff]   ;;  %v2595_v14 = vld [vmem:[#allocation7 + $0x2c8] ss:$16 sps:$4 sm:$0xff]  }
 0x125   :  { %v2598_v15 = vld [vmem:[#allocation7 + $0x4c8] ss:$16 sps:$4 sm:$0xff]  }
 0x127   :  { %1583 = vmatpush1.bf16.msra.mxu1 %v2523_v16  ;;  %1624 = vmatpush1.bf16.msra.mxu0 %v2526_v17  ;;  %v2603_v16 = vld [vmem:[#allocation7 + $0x2ac] ss:$16 sps:$4 sm:$0xff]  }
 0x128   :  { %1584 = vmatprep.subr.bf16.mxu1 %v2531_v18  ;;  %1625 = vmatprep.subr.bf16.mxu0 %v2534_v19  ;;  %v2606_v17 = vld [vmem:[#allocation7 + $0x4ac] ss:$16 sps:$4 sm:$0xff]   ;;  %v2601_v18 = vld [vmem:[#allocation7 + $0x2a8] ss:$16 sps:$4 sm:$0xff]  }
 0x129   :  { %v2604_v19 = vld [vmem:[#allocation7 + $0x4a8] ss:$16 sps:$4 sm:$0xff]  }
 0x12b   :  { %1585 = vmatpush1.bf16.msra.mxu1 %v2529_v20  ;;  %1626 = vmatpush1.bf16.msra.mxu0 %v2532_v27  ;;  %v2609_v20 = vld [vmem:[#allocation7 + $0x28c] ss:$16 sps:$4 sm:$0xff]   ;;  %v2607_v27 = vld [vmem:[#allocation7 + $0x288] ss:$16 sps:$4 sm:$0xff]  }
 0x12c   :  { %1586 = vmatprep.subr.bf16.mxu1 %v2537_v28  ;;  %1627 = vmatprep.subr.bf16.mxu0 %v2540_v29  ;;  %v2615_v28 = vld [vmem:[#allocation7 + $0x26c] ss:$16 sps:$4 sm:$0xff]   ;;  %v2613_v29 = vld [vmem:[#allocation7 + $0x268] ss:$16 sps:$4 sm:$0xff]  }
 0x12f   :  { %1587 = vmatpush1.bf16.msra.mxu1 %v2535_v30  ;;  %1628 = vmatpush1.bf16.msra.mxu0 %v2538_v31  ;;  %v2616_v30 = vld [vmem:[#allocation7 + $0x468] ss:$16 sps:$4 sm:$0xff]   ;;  %v2621_v31 = vld [vmem:[#allocation7 + $0x24c] ss:$16 sps:$4 sm:$0xff]  }
 0x130   :  { %1588 = vmatprep.subr.bf16.mxu1 %v2543_v32  ;;  %1629 = vmatprep.subr.bf16.mxu0 %v2546_v33  ;;  %v2624_v32 = vld [vmem:[#allocation7 + $0x44c] ss:$16 sps:$4 sm:$0xff]   ;;  %v2619_v33 = vld [vmem:[#allocation7 + $0x248] ss:$16 sps:$4 sm:$0xff]  }
 0x133   :  { %1589 = vmatpush2.bf16.msra.mxu1 %v2541_v34  ;;  %1630 = vmatpush2.bf16.msra.mxu0 %v2544_v35  ;;  %v2622_v34 = vld [vmem:[#allocation7 + $0x448] ss:$16 sps:$4 sm:$0xff]   ;;  %v2627_v35 = vld [vmem:[#allocation7 + $0x22c] ss:$16 sps:$4 sm:$0xff]  }
 0x134   :  { %1590 = vmatprep.subr.bf16.mxu1 %v2549_v36  ;;  %1631 = vmatprep.subr.bf16.mxu0 %v2552_v37  ;;  %v2630_v36 = vld [vmem:[#allocation7 + $0x42c] ss:$16 sps:$4 sm:$0xff]   ;;  %v2625_v37 = vld [vmem:[#allocation7 + $0x228] ss:$16 sps:$4 sm:$0xff]  }
 0x137   :  { %1591 = vmatpush2.bf16.msra.mxu1 %v2547_v38  ;;  %1632 = vmatpush2.bf16.msra.mxu0 %v2550_v39  ;;  %v2628_v38 = vld [vmem:[#allocation7 + $0x428] ss:$16 sps:$4 sm:$0xff]   ;;  %v2633_v39 = vld [vmem:[#allocation7 + $0x20c] ss:$16 sps:$4 sm:$0xff]  }
 0x138   :  { %1592 = vmatprep.subr.bf16.mxu1 %v2555_v40  ;;  %1633 = vmatprep.subr.bf16.mxu0 %v2558_v41  ;;  %v2636_v40 = vld [vmem:[#allocation7 + $0x40c] ss:$16 sps:$4 sm:$0xff]   ;;  %v2631_v41 = vld [vmem:[#allocation7 + $0x208] ss:$16 sps:$4 sm:$0xff]  }
 0x13b   :  { %1593 = vmatpush2.bf16.msra.mxu1 %v2553_v42  ;;  %1634 = vmatpush2.bf16.msra.mxu0 %v2556_v43  ;;  %v2634_v42 = vld [vmem:[#allocation7 + $0x408] ss:$16 sps:$4 sm:$0xff]   ;;  %v2639_v43 = vld [vmem:[#allocation7 + $0x3ec] ss:$16 sps:$4 sm:$0xff]  }
 0x13c   :  { %1594 = vmatprep.subr.bf16.mxu1 %v2561_v44  ;;  %1635 = vmatprep.subr.bf16.mxu0 %v2564_v45  ;;  %v2642_v44 = vld [vmem:[#allocation7 + $0x5ec] ss:$16 sps:$4 sm:$0xff]   ;;  %v2637_v45 = vld [vmem:[#allocation7 + $0x3e8] ss:$16 sps:$4 sm:$0xff]  }
 0x13f   :  { %1595 = vmatpush2.bf16.msra.mxu1 %v2559_v47  ;;  %1636 = vmatpush2.bf16.msra.mxu0 %v2562_v48  ;;  %v2640_v47 = vld [vmem:[#allocation7 + $0x5e8] ss:$16 sps:$4 sm:$0xff]   ;;  %v2645_v48 = vld [vmem:[#allocation7 + $0x3cc] ss:$16 sps:$4 sm:$0xff]  }
 0x140   :  { %1596 = vmatprep.subr.bf16.mxu1 %v2567_v49  ;;  %1637 = vmatprep.subr.bf16.mxu0 %v2570_v51  ;;  %v2648_v49 = vld [vmem:[#allocation7 + $0x5cc] ss:$16 sps:$4 sm:$0xff]   ;;  %v2643_v51 = vld [vmem:[#allocation7 + $0x3c8] ss:$16 sps:$4 sm:$0xff]  }
 0x143   :  { %1597 = vmatpush2.bf16.msra.mxu1 %v2565_v52  ;;  %1638 = vmatpush2.bf16.msra.mxu0 %v2568_v53  ;;  %v2646_v52 = vld [vmem:[#allocation7 + $0x5c8] ss:$16 sps:$4 sm:$0xff]   ;;  %v2651_v53 = vld [vmem:[#allocation7 + $0x3ac] ss:$16 sps:$4 sm:$0xff]  }
 0x144   :  { %1598 = vmatprep.subr.bf16.mxu1 %v2573_v57  ;;  %1639 = vmatprep.subr.bf16.mxu0 %v2576_v58  ;;  %v2649_v57 = vld [vmem:[#allocation7 + $0x3a8] ss:$16 sps:$4 sm:$0xff]  }
 0x145   :  { %v2652_v58 = vld [vmem:[#allocation7 + $0x5a8] ss:$16 sps:$4 sm:$0xff]  }
 0x147   :  { %1599 = vmatpush2.bf16.msra.mxu1 %v2571_v59  ;;  %1640 = vmatpush2.bf16.msra.mxu0 %v2574_v60  ;;  %v2657_v59 = vld [vmem:[#allocation7 + $0x38c] ss:$16 sps:$4 sm:$0xff]  }
 0x148   :  { %1600 = vmatprep.subr.bf16.mxu1 %v2579_v62  ;;  %1641 = vmatprep.subr.bf16.mxu0 %v2582_v63  ;;  %v2660_v60 = vld [vmem:[#allocation7 + $0x58c] ss:$16 sps:$4 sm:$0xff]   ;;  %v2658_v62 = vld [vmem:[#allocation7 + $0x588] ss:$16 sps:$4 sm:$0xff]  }
 0x149   :  { %v2663_v63 = vld [vmem:[#allocation7 + $0x36c] ss:$16 sps:$4 sm:$0xff]  }
 0x14b   :  { %1601 = vmatpush2.bf16.msra.mxu1 %v2577_v0  ;;  %1642 = vmatpush2.bf16.msra.mxu0 %v2580_v1  ;;  %v2666_v0 = vld [vmem:[#allocation7 + $0x56c] ss:$16 sps:$4 sm:$0xff]   ;;  %v2661_v1 = vld [vmem:[#allocation7 + $0x368] ss:$16 sps:$4 sm:$0xff]  }
 0x14c   :  { %1602 = vmatprep.subr.bf16.mxu1 %v2585_v3  ;;  %1643 = vmatprep.subr.bf16.mxu0 %v2588_v4  ;;  %v2669_v3 = vld [vmem:[#allocation7 + $0x34c] ss:$16 sps:$4 sm:$0xff]  }
 0x14d   :  { %v2672_v4 = vld [vmem:[#allocation7 + $0x54c] ss:$16 sps:$4 sm:$0xff]  }
 0x14f   :  { %1603 = vmatpush2.bf16.msra.mxu1 %v2583_v6  ;;  %1644 = vmatpush2.bf16.msra.mxu0 %v2586_v7  ;;  %v2667_v6 = vld [vmem:[#allocation7 + $0x348] ss:$16 sps:$4 sm:$0xff]  }
 0x150   :  { %1654 = vmatprep.subr.bf16.mxu1 %v2591_v24  ;;  %1695 = vmatprep.subr.bf16.mxu0 %v2594_v9  ;;  %v2670_v7 = vld [vmem:[#allocation7 + $0x548] ss:$16 sps:$4 sm:$0xff]   ;;  %v2678_v24 = vld [vmem:[#allocation7 + $0x52c] ss:$16 sps:$4 sm:$0xff]  }
 0x151   :  { %v2673_v9 = vld [vmem:[#allocation7 + $0x328] ss:$16 sps:$4 sm:$0xff]  }
 0x152   :  { %1605 = vmatmul.mubr.bf16.vlgmr.msra.gmra.mxu1 %v2935_v11  ;;  %1646 = vmatmul.mubr.bf16.vlgmr.msra.gmra.mxu0 %v2922_v54  ;;  %v2612_v54 = vld [vmem:[#allocation7 + $0x48c] ss:$16 sps:$4 sm:$0xff]  }
 0x153   :  { %1655 = vmatpush1.bf16.msra.mxu1 %v2589_v10  ;;  %1686 = vmatprep.mubr.bf16.mxu1 %v2919_v50  ;;  %v2610_v50 = vld [vmem:[#allocation7 + $0x488] ss:$16 sps:$4 sm:$0xff]  }
 0x154   :  { %1696 = vmatpush1.bf16.msra.mxu0 %v2592_v56  ;;  %1727 = vmatprep.mubr.bf16.mxu0 %v2929_v5  ;;  %v2618_v5 = vld [vmem:[#allocation7 + $0x46c] ss:$16 sps:$4 sm:$0xff]   ;;  %v2676_v10 = vld [vmem:[#allocation7 + $0x528] ss:$16 sps:$4 sm:$0xff]  }
 0x155   :  { %1656 = vmatprep.subr.bf16.mxu1 %v2597_v12  ;;  %1697 = vmatprep.subr.bf16.mxu0 %v2600_v13  ;;  %v2681_v56 = vld [vmem:[#allocation7 + $0x30c] ss:$16 sps:$4 sm:$0xff]   ;;  %v2679_v13 = vld [vmem:[#allocation7 + $0x308] ss:$16 sps:$4 sm:$0xff]  }
 0x156   :  { %v2684_v12 = vld [vmem:[#allocation7 + $0x50c] ss:$16 sps:$4 sm:$0xff]  }
 0x157   :  { %1657 = vmatpush1.bf16.msra.mxu1 %v2595_v14  ;;  %v2682_v14 = vld [vmem:[#allocation7 + $0x508] ss:$16 sps:$4 sm:$0xff]  }
 0x158   :  { %1698 = vmatpush1.bf16.msra.mxu0 %v2598_v15  ;;  %1658 = vmatprep.subr.bf16.mxu1 %v2603_v16  ;;  %v2685_v15 = vld [vmem:[#allocation9 + $0x78] sm:$0xff]  }
 0x159   :  { %1699 = vmatprep.subr.bf16.mxu0 %v2606_v17  ;;  %v2686_v16 = vld [vmem:[#allocation9 + $0x38] sm:$0xff]   ;;  %v2687_v17 = vld [vmem:[#allocation9 + $0x70] sm:$0xff]  }
 0x15b   :  { %1659 = vmatpush1.bf16.msra.mxu1 %v2601_v18  ;;  %v2688_v18 = vld [vmem:[#allocation9 + $0x30] sm:$0xff]  }
 0x15c   :  { %1700 = vmatpush1.bf16.msra.mxu0 %v2604_v19  ;;  %1660 = vmatprep.subr.bf16.mxu1 %v2609_v20  ;;  %v2689_v19 = vld [vmem:[#allocation9 + $0x68] sm:$0xff]  }
 0x15d   :  { %1701 = vmatprep.subr.bf16.mxu0 %v2612_v54  ;;  %v2690_v20 = vld [vmem:[#allocation9 + $0x28] sm:$0xff]   ;;  %v2691_v54 = vld [vmem:[#allocation9 + $0x60] sm:$0xff]  }
 0x15f   :  { %1661 = vmatpush1.bf16.msra.mxu1 %v2607_v27  ;;  %v2692_v27 = vld [vmem:[#allocation9 + $0x20] sm:$0xff]  }
 0x160   :  { %1702 = vmatpush1.bf16.msra.mxu0 %v2610_v50  ;;  %1662 = vmatprep.subr.bf16.mxu1 %v2615_v28  ;;  %v2693_v50 = vld [vmem:[#allocation9 + $0x58] sm:$0xff]  }
 0x161   :  { %1703 = vmatprep.subr.bf16.mxu0 %v2618_v5  ;;  %v2701_v28 = vld [vmem:[#allocation9 + $0xf8] sm:$0xff]  }
 0x162   :  { %v2702_v5 = vld [vmem:[#allocation9 + $0xb8] sm:$0xff]  }
 0x163   :  { %1663 = vmatpush1.bf16.msra.mxu1 %v2613_v29  ;;  %v2703_v29 = vld [vmem:[#allocation9 + $0xf0] sm:$0xff]  }
 0x164   :  { %1704 = vmatpush1.bf16.msra.mxu0 %v2616_v30  ;;  %1664 = vmatprep.subr.bf16.mxu1 %v2621_v31  ;;  %v2695_v30 = vld [vmem:[#allocation9 + $0x50] sm:$0xff]   ;;  %v2705_v31 = vld [vmem:[#allocation9 + $0xe8] sm:$0xff]  }
 0x165   :  { %1705 = vmatprep.subr.bf16.mxu0 %v2624_v32  ;;  %v2696_v32 = vld [vmem:[#allocation9 + $0x10] sm:$0xff]  }
 0x167   :  { %1665 = vmatpush1.bf16.msra.mxu1 %v2619_v33  ;;  %v2706_v33 = vld [vmem:[#allocation9 + $0xa8] sm:$0xff]  }
 0x168   :  { %1706 = vmatpush1.bf16.msra.mxu0 %v2622_v34  ;;  %1666 = vmatprep.subr.bf16.mxu1 %v2627_v35  ;;  %v2697_v34 = vld [vmem:[#allocation9 + $0x48] sm:$0xff]   ;;  %v2707_v35 = vld [vmem:[#allocation9 + $0xe0] sm:$0xff]  }
 0x169   :  { %1707 = vmatprep.subr.bf16.mxu0 %v2630_v36  ;;  %v2698_v36 = vld [vmem:[#allocation9 + $0x8] sm:$0xff]  }
 0x16b   :  { %1667 = vmatpush1.bf16.msra.mxu1 %v2625_v37  ;;  %v2708_v37 = vld [vmem:[#allocation9 + $0xa0] sm:$0xff]  }
 0x16c   :  { %1708 = vmatpush1.bf16.msra.mxu0 %v2628_v38  ;;  %1668 = vmatprep.subr.bf16.mxu1 %v2633_v39  ;;  %v2699_v38 = vld [vmem:[#allocation9 + $0x40] sm:$0xff]   ;;  %v2709_v39 = vld [vmem:[#allocation9 + $0xd8] sm:$0xff]  }
 0x16d   :  { %1709 = vmatprep.subr.bf16.mxu0 %v2636_v40  ;;  %v2700_v40 = vld [vmem:[#allocation9] sm:$0xff]  }
 0x16f   :  { %1669 = vmatpush1.bf16.msra.mxu1 %v2631_v41  ;;  %v2710_v41 = vld [vmem:[#allocation9 + $0x98] sm:$0xff]  }
 0x170   :  { %1710 = vmatpush1.bf16.msra.mxu0 %v2634_v42  ;;  %1670 = vmatprep.subr.bf16.mxu1 %v2639_v43  ;;  %v2711_v42 = vld [vmem:[#allocation9 + $0xd0] sm:$0xff]  }
 0x171   :  { %1711 = vmatprep.subr.bf16.mxu0 %v2642_v44 }
 0x173   :  { %1671 = vmatpush2.bf16.msra.mxu1 %v2637_v45  ;;  %v2712_v45 = vld [vmem:[#allocation9 + $0x90] sm:$0xff]  }
 0x174   :  { %1712 = vmatpush2.bf16.msra.mxu0 %v2640_v47  ;;  %1672 = vmatprep.subr.bf16.mxu1 %v2645_v48 }
 0x175   :  { %1713 = vmatprep.subr.bf16.mxu0 %v2648_v49  ;;  %v2713_v49 = vld [vmem:[#allocation9 + $0xc8] sm:$0xff]  }
 0x177   :  { %1673 = vmatpush2.bf16.msra.mxu1 %v2643_v51 }
 0x178   :  { %1714 = vmatpush2.bf16.msra.mxu0 %v2646_v52  ;;  %1674 = vmatprep.subr.bf16.mxu1 %v2651_v53  ;;  %v2714_v53 = vld [vmem:[#allocation9 + $0x88] sm:$0xff]  }
 0x179   :  { %1715 = vmatprep.subr.bf16.mxu0 %v2654_v55 }
 0x17b   :  { %1675 = vmatpush2.bf16.msra.mxu1 %v2649_v57 }
 0x17c   :  { %1716 = vmatpush2.bf16.msra.mxu0 %v2652_v58  ;;  %1676 = vmatprep.subr.bf16.mxu1 %v2657_v59  ;;  %v2715_v58 = vld [vmem:[#allocation9 + $0xc0] sm:$0xff]  }
 0x17d   :  { %1717 = vmatprep.subr.bf16.mxu0 %v2660_v60  ;;  %v2716_v59 = vld [vmem:[#allocation9 + $0x80] sm:$0xff]  }
 0x17e   :  { %v508_v60 = vld [vmem:[%s2964_s4] sm:$0xf] }
 0x17f   :  { %1677 = vmatpush2.bf16.msra.mxu1 %v2655_v61  ;;  %v513_v61 = vrot.slane %v508_v60, %v103_v22 }
 0x180   :  { %1718 = vmatpush2.bf16.msra.mxu0 %v2658_v62  ;;  %1678 = vmatprep.subr.bf16.mxu1 %v2663_v63  ;;  %v517_v62 = vrot.slane %v508_v60, %v107_v25  ;;  %v521_v25 = vrot.slane %v508_v60, %v111_v23 }
 0x181   :  { %1719 = vmatprep.subr.bf16.mxu0 %v2666_v0 }
 0x183   :  { %1679 = vmatpush2.bf16.msra.mxu1 %v2661_v1 }
 0x184   :  { %1720 = vmatpush2.bf16.msra.mxu0 %v2664_v2  ;;  %1680 = vmatprep.subr.bf16.mxu1 %v2669_v3 }
 0x185   :  { %1721 = vmatprep.subr.bf16.mxu0 %v2672_v4 }
 0x187   :  { %1681 = vmatpush2.bf16.msra.mxu1 %v2667_v6 }
 0x188   :  { %1722 = vmatpush2.bf16.msra.mxu0 %v2670_v7  ;;  %1682 = vmatprep.subr.bf16.mxu1 %v2675_v8 }
 0x189   :  { %1723 = vmatprep.subr.bf16.mxu0 %v2678_v24 }
 0x18b   :  { %1683 = vmatpush2.bf16.msra.mxu1 %v2673_v9 }
 0x18c   :  { %1724 = vmatpush2.bf16.msra.mxu0 %v2676_v10  ;;  %1684 = vmatprep.subr.bf16.mxu1 %v2681_v56 }
 0x18d   :  { %1725 = vmatprep.subr.bf16.mxu0 %v2684_v12 }
 0x18f   :  { %1685 = vmatpush2.bf16.msra.mxu1 %v2679_v13 }
 0x190   :  { %1726 = vmatpush2.bf16.msra.mxu0 %v2682_v14  ;;  %2331 = vmatprep.subr.bf16.mxu1 %v2685_v15 }
 0x191   :  { %2353 = vmatprep.subr.bf16.mxu0 %v2701_v28 }
 0x192   :  { %1687 = vmatmul.mubr.bf16.vlgmr.msra.gmra.mxu1 %v2917_v46  ;;  %v2694_v46 = vld [vmem:[#allocation9 + $0x18] sm:$0xff]  }
 0x193   :  { %1728 = vmatmul.mubr.bf16.vlgmr.msra.gmra.mxu0 %v2935_v11  ;;  %2332 = vmatpush3.bf16.msra.mxu1 %v2686_v16  ;;  %v2704_v11 = vld [vmem:[#allocation9 + $0xb0] sm:$0xff]   ;;  %v525_v16 = vrot.slane %v508_v60, %v115_v26 }
 0x194   :  { %2333 = vmatprep.subr.bf16.mxu1 %v2687_v17  ;;  %2354 = vmatpush3.bf16.msra.mxu0 %v2702_v5 }
 0x195   :  { %2355 = vmatprep.subr.bf16.mxu0 %v2703_v29 }
 0x197   :  { %2334 = vmatpush3.bf16.msra.mxu1 %v2688_v18 }
 0x198   :  { %2335 = vmatprep.subr.bf16.mxu1 %v2689_v19  ;;  %2356 = vmatpush3.bf16.msra.mxu0 %v2704_v11 }
 0x199   :  { %2357 = vmatprep.subr.bf16.mxu0 %v2705_v31 }
 0x19b   :  { %2336 = vmatpush3.bf16.msra.mxu1 %v2690_v20 }
 0x19c   :  { %2337 = vmatprep.subr.bf16.mxu1 %v2691_v54  ;;  %2358 = vmatpush3.bf16.msra.mxu0 %v2706_v33 }
 0x19d   :  { %2359 = vmatprep.subr.bf16.mxu0 %v2707_v35 }
 0x19f   :  { %2338 = vmatpush3.bf16.msra.mxu1 %v2692_v27 }
 0x1a0   :  { %2339 = vmatprep.subr.bf16.mxu1 %v2693_v50  ;;  %2360 = vmatpush3.bf16.msra.mxu0 %v2708_v37 }
 0x1a1   :  { %2361 = vmatprep.subr.bf16.mxu0 %v2709_v39 }
 0x1a3   :  { %2340 = vmatpush3.bf16.msra.mxu1 %v2694_v46 }
 0x1a4   :  { %2341 = vmatprep.subr.bf16.mxu1 %v2695_v30  ;;  %2362 = vmatpush3.bf16.msra.mxu0 %v2710_v41 }
 0x1a5   :  { %2363 = vmatprep.subr.bf16.mxu0 %v2711_v42 }
 0x1a7   :  { %2342 = vmatpush3.bf16.msra.mxu1 %v2696_v32 }
 0x1a8   :  { %2343 = vmatprep.subr.bf16.mxu1 %v2697_v34  ;;  %2364 = vmatpush3.bf16.msra.mxu0 %v2712_v45 }
 0x1a9   :  { %2365 = vmatprep.subr.bf16.mxu0 %v2713_v49 }
 0x1ab   :  { %2344 = vmatpush3.bf16.msra.mxu1 %v2698_v36 }
 0x1ac   :  { %2345 = vmatprep.subr.bf16.mxu1 %v2699_v38  ;;  %2366 = vmatpush3.bf16.msra.mxu0 %v2714_v53  ;;  %v2298_v38 = vld [vmem:[%s2966_s6] ss:$0 sm:$0xff] }
 0x1ad   :  { %2367 = vmatprep.subr.bf16.mxu0 %v2715_v58 }
 0x1af   :  { %2346 = vmatpush3.bf16.msra.mxu1 %v2700_v40 }
 0x1b0   :  { %2368 = vmatpush3.bf16.msra.mxu0 %v2716_v59 }
 0x1d2   :  { %v1524_v43 = vpop.f32.mrf.mxu1  ;;  %v1565_v44 = vpop.f32.mrf.mxu0 }
 0x1d3   :  { %v1525_v63 = vadd.f32 %v1524_v43, %v513_v61 }
 0x1d4   :  { %v1526_v47 = vpop.f32.mrf.mxu1  ;;  %v1567_v48 = vpop.f32.mrf.mxu0 }
 0x1d5   :  { %v1527_v0 = vadd.f32 %v1526_v47, %v517_v62  ;;  %v1566_v1 = vadd.f32 %v1565_v44, %v1525_v63 }
 0x1d6   :  { %v1528_v51 = vpop.f32.mrf.mxu1  ;;  %v1569_v52 = vpop.f32.mrf.mxu0 }
 0x1d7   :  { %v1568_v4 = vadd.f32 %v1567_v48, %v1527_v0 }
 0x1d8   :  { %v1529_v55 = vpop.f32.mrf.mxu1  ;;  %v1570_v57 = vpop.f32.mrf.mxu0 }
 0x212   :  { %v1606_v2 = vpop.f32.mrf.mxu1  ;;  %v1647_v3 = vpop.f32.mrf.mxu0 }
 0x213   :  { %v1607_v6 = vadd.f32 %v1606_v2, %v1566_v1  ;;  %v1648_v17 = vadd.f32 %v1647_v3, %v521_v25 }
 0x214   :  { %v1608_v7 = vpop.f32.mrf.mxu1  ;;  %v1649_v8 = vpop.f32.mrf.mxu0 }
 0x215   :  { %v1609_v24 = vadd.f32 %v1608_v7, %v1568_v4  ;;  %v1736_v9 = vmax.f32 %v1607_v6, 0.0  ;;  %v1650_v19 = vadd.f32 %v1649_v8, %v525_v16 }
 0x216   :  { %v1610_v10 = vpop.f32.mrf.mxu1  ;;  %v1651_v56 = vpop.f32.mrf.mxu0 }
 0x217   :  { %v1737_v12 = vmax.f32 %v1609_v24, 0.0  ;;  %v1740_v15 = vpack.c.bf16 %v1736_v9, %v1736_v9 }
 0x218   :  { %v1611_v13 = vpop.f32.mrf.mxu1  ;;  %v1652_v14 = vpop.f32.mrf.mxu0 }
 0x219   :  { %v1741_v22 = vpack.c.bf16 %v1737_v12, %v1737_v12 }
 0x21b   :  { %2039 = vmatprep.mubr.bf16.mxu1 %v1741_v22 }
 0x21c   :  { %2040 = vmatmul.mubr.bf16.vlgmr.msra.gmra.mxu1 %v1740_v15 }
 0x252   :  { %v1688_v18 = vpop.f32.mrf.mxu1 }
 0x253   :  { %v1689_v20 = vadd.f32 %v1688_v18, %v1648_v17  ;;  %v1729_v54 = vpop.f32.mrf.mxu0 }
 0x254   :  { %v1690_v27 = vpop.f32.mrf.mxu1 }
 0x255   :  { %v1730_v50 = vadd.f32 %v1729_v54, %v1689_v20  ;;  %v1691_v28 = vadd.f32 %v1690_v27, %v1650_v19  ;;  %v1731_v5 = vpop.f32.mrf.mxu0 }
 0x256   :  { %v1692_v29 = vpop.f32.mrf.mxu1 }
 0x257   :  { %v1732_v46 = vadd.f32 %v1731_v5, %v1691_v28  ;;  %v1733_v11 = vpop.f32.mrf.mxu0  ;;  %v1738_v30 = vmax.f32 %v1730_v50, 0.0 }
 0x258   :  { %v1693_v31 = vpop.f32.mrf.mxu1 }
 0x259   :  { %v1739_v32 = vmax.f32 %v1732_v46, 0.0  ;;  %v1734_v33 = vpop.f32.mrf.mxu0  ;;  %v1742_v34 = vpack.c.bf16 %v1738_v30, %v1738_v30 }
 0x25b   :  { %v1743_v23 = vpack.c.bf16 %v1739_v32, %v1739_v32 }
 0x25d   :  { %2079 = vmatprep.mubr.bf16.mxu0 %v1743_v23 }
 0x25e   :  { %2080 = vmatmul.mubr.bf16.vlgmr.msra.gmra.mxu0 %v1742_v34 }
 0x2dc   :  { %v2347_v21 = vpop.f32.mrf.mxu1 }
 0x2de   :  { %v2348_v26 = vpop.f32.mrf.mxu1 }
 0x2df   :  { %v2349_v35 = vadd.f32 %v2348_v26, %v2347_v21 }
 0x2e0   :  { %v2350_v36 = vpop.f32.mrf.mxu1 }
 0x2e1   :  { %v2042_v41 = vadd.f32 %v2349_v35, %v2298_v38 }
 0x2e2   :  { %v2351_v37 = vpop.f32.mrf.mxu1 }
 0x31e   :  { %v2369_v39 = vpop.f32.mrf.mxu0 }
 0x320   :  { %v2370_v40 = vpop.f32.mrf.mxu0 }
 0x321   :  { %v2371_v42 = vadd.f32 %v2370_v40, %v2369_v39 }
 0x322   :  { %v2372_v43 = vpop.f32.mrf.mxu0 }
 0x323   :  { %v2082_v44 = vadd.f32 %v2371_v42, %v2042_v41 }
 0x324   :  { %v2373_v45 = vpop.f32.mrf.mxu0 }
 0x325   :  { %2717 = vtanh.f32 %v2082_v44 }
 0x332   :  { %v2718_v47 = vpop.eup %2717 }
 0x333   :  { %v2088_v48 = vmul.f32 6.0, %v2718_v47 }
 0x335   :  { %2089 = vst [vmem:[%s2967_s7] sm:$0xff] %v2088_v48 }
 0x336   :  { %2094 = vsyncpa [#allocation3], 1 }
 0x337   :  { %2095 = vsyncpa [#allocation5], 1 }
 0x338   :  { %2096 = vsyncpa [#allocation8], 1 }

</bundles_post_ra>
